<compile_context>
chip_gen: v6e
topology: v6e:2x2x1
jax: 0.10.0
libtpu: 0.0.40
codegen_flags: <defaults>
</compile_context>

<pallas_src>
import functools
import math

import jax
import jax.numpy as jnp
from jax.experimental import pallas as pl
from jax.experimental.pallas import tpu as pltpu


def _cdiv(a, b):
    return -(-a // b)


def _round_up(a, b):
    return _cdiv(a, b) * b


def _dice_sums_kernel(x_ref, y_ref, tp_ref, ss_ref, sy_ref, *,
                      l_valid, l_chunk, mask_lanes):
    # x_ref / y_ref: (tile_rows, l_chunk) tile in VMEM.
    # tp/ss/sy refs: (tile_rows, 1) output blocks, VMEM-resident across k
    # (their index_map is constant over the reduction axis).
    k = pl.program_id(1)

    @pl.when(k == 0)
    def _():
        tp_ref[...] = jnp.zeros_like(tp_ref)
        ss_ref[...] = jnp.zeros_like(ss_ref)
        sy_ref[...] = jnp.zeros_like(sy_ref)

    xv = x_ref[...]
    if xv.dtype == jnp.bfloat16:
        # Keep the transcendental narrow (bf16 EUP on v6e/v7x); accumulate in f32.
        s = jax.nn.sigmoid(xv).astype(jnp.float32)
    else:
        s = jax.nn.sigmoid(xv.astype(jnp.float32))
    yv = y_ref[...].astype(jnp.float32)

    if mask_lanes:
        # Ragged tail of the L axis: zero contributions from lanes >= L.
        # Cheap VPU work that hides under the HBM-bound DMA; jnp.where (select)
        # is NaN-safe for the unspecified out-of-bounds values.
        lane = jax.lax.broadcasted_iota(jnp.int32, x_ref.shape, 1)
        valid = (k * l_chunk + lane) < l_valid
        s = jnp.where(valid, s, 0.0)
        yv = jnp.where(valid, yv, 0.0)

    tp_ref[...] += jnp.sum(s * yv, axis=-1, keepdims=True)
    ss_ref[...] += jnp.sum(s, axis=-1, keepdims=True)
    sy_ref[...] += jnp.sum(yv, axis=-1, keepdims=True)


def _device_config():
    try:
        kind = jax.devices()[0].device_kind.lower()
    except Exception:
        kind = ""
    mib = 1024 * 1024
    if "v7" in kind:
        # 64 MiB physical VMEM, 2 TensorCores, 3.2 TB/s: larger blocks pay,
        # but stay well clear of physical VMEM (budget counts x+y block bytes).
        return dict(l_target=4096, row_cap=512, block_bytes=12 * mib,
                    vmem_limit=56 * mib, num_tc=2)
    if "v6" in kind:
        # 128 MiB VMEM, 1 TC: modest gains from bigger blocks.
        return dict(l_target=8192, row_cap=512, block_bytes=16 * mib,
                    vmem_limit=96 * mib, num_tc=1)
    # v5e / unknown: ~4 MiB-per-input blocks are already <4% step overhead.
    return dict(l_target=4096, row_cap=256, block_bytes=8 * mib,
                vmem_limit=48 * mib, num_tc=1)


def dice_loss(x, y, smooth=1.0, *, l_chunk_target=None, row_tile_target=None):
    """Pallas equivalent of DiceLoss(smooth=smooth, dims=(-2, -1))(x, y)."""
    assert x.shape == y.shape and x.ndim >= 2
    R = int(math.prod(x.shape[:-2]))
    L = x.shape[-2] * x.shape[-1]

    # Stream both inputs in their native dtype (pass a bf16/int8 binary mask
    # for y to cut HBM traffic); accumulation happens in f32 inside the kernel.
    x2 = x.reshape(R, L)
    y2 = y.reshape(R, L)

    cfg = _device_config()
    l_target = int(l_chunk_target) if l_chunk_target is not None else cfg["l_target"]
    row_cap_req = int(row_tile_target) if row_tile_target is not None else cfg["row_cap"]

    # ---- reduction-axis (L) chunking: fewest <= l_target chunks, 128-aligned ----
    n_chunks = _cdiv(L, max(1, l_target))
    if n_chunks <= 1:
        l_chunk = L                      # block dim == full array dim: always legal
    else:
        l_chunk = _round_up(_cdiv(L, n_chunks), 128)
    grid_k = _cdiv(L, l_chunk)
    mask_lanes = (L % l_chunk) != 0      # ragged tail masked in-kernel (no jnp.pad)

    # ---- row tiling: fewest <= row_cap tiles, 8-aligned, VMEM-budget aware ----
    per_row_bytes = l_chunk * (x2.dtype.itemsize + y2.dtype.itemsize)
    rows_budget = max(8, (cfg["block_bytes"] // per_row_bytes) // 8 * 8)
    row_cap = max(8, (min(row_cap_req, rows_budget) // 8) * 8)
    n_row_tiles = _cdiv(R, row_cap)
    if cfg["num_tc"] > 1:
        # Give every TensorCore at least one row tile (row axis is "parallel").
        n_row_tiles = max(n_row_tiles, min(cfg["num_tc"], _cdiv(R, 8)))
    tile_rows = _round_up(_cdiv(R, n_row_tiles), 8)
    grid_rows = _cdiv(R, tile_rows)
    # TODO(synk): for R too small to split while L is huge, a leading size-2
    # "parallel" axis over half-reductions would give v7x's 2nd TensorCore work.

    out_sds = jax.ShapeDtypeStruct((R, 1), jnp.float32)
    in_block = pl.BlockSpec((tile_rows, l_chunk), lambda i, k: (i, k))
    out_block = pl.BlockSpec((tile_rows, 1), lambda i, k: (i, 0))

    kernel = functools.partial(_dice_sums_kernel, l_valid=L, l_chunk=l_chunk,
                               mask_lanes=mask_lanes)

    tp, ss, sy = pl.pallas_call(
        kernel,
        out_shape=(out_sds, out_sds, out_sds),
        grid_spec=pltpu.PrefetchScalarGridSpec(
            num_scalar_prefetch=0,
            grid=(grid_rows, grid_k),
            in_specs=[in_block, in_block],
            out_specs=(out_block, out_block, out_block),
        ),
        compiler_params=pltpu.CompilerParams(
            dimension_semantics=("parallel", "arbitrary"),
            vmem_limit_bytes=cfg["vmem_limit"],
        ),
    )(x2, y2)

    tp = tp[:, 0]
    ss = ss[:, 0]
    sy = sy[:, 0]
    # fp = ss - tp, fn = sy - tp  =>  2*tp + fp + fn = ss + sy
    dc = (2.0 * tp + smooth) / (ss + sy + smooth)
    return 1.0 - jnp.mean(dc)


def _dice_loss_ref(x, y, smooth=1.0):
    # Pure-JAX reference mirroring the PyTorch module.
    xs = jax.nn.sigmoid(x.astype(jnp.float32))
    yf = y.astype(jnp.float32)
    tp = jnp.sum(xs * yf, axis=(-2, -1))
    fp = jnp.sum(xs * (1.0 - yf), axis=(-2, -1))
    fn = jnp.sum((1.0 - xs) * yf, axis=(-2, -1))
    dc = (2.0 * tp + smooth) / (2.0 * tp + fp + fn + smooth)
    return 1.0 - jnp.mean(dc)


if __name__ == "__main__":
    key = jax.random.PRNGKey(0)
    kx, ky, kx2, ky2 = jax.random.split(key, 4)

    # Standard small NCHW example (single L-chunk, single row-tile path).
    B, C, H, W = 2, 4, 16, 16
    x = jax.random.normal(kx, (B, C, H, W), dtype=jnp.float32)
    # Binary targets streamed as bf16: exact for 0/1 masks, half the HBM bytes.
    y = (jax.random.uniform(ky, (B, C, H, W)) > 0.5).astype(jnp.bfloat16)

    loss = jax.block_until_ready(dice_loss(x, y, smooth=1.0))
    ref = jax.block_until_ready(_dice_loss_ref(x, y, smooth=1.0))
    assert jnp.allclose(loss, ref, atol=1e-5, rtol=1e-5), (loss, ref)

    # Ragged shape exercising the in-kernel lane mask, multi-chunk reduction
    # and a partial last row tile (tiny forced tiles so shapes stay small).
    x_r = jax.random.normal(kx2, (3, 5, 9, 33), dtype=jnp.float32)   # R=15, L=297
    y_r = (jax.random.uniform(ky2, (3, 5, 9, 33)) > 0.5).astype(jnp.bfloat16)
    loss_r = jax.block_until_ready(
        dice_loss(x_r, y_r, smooth=1.0, l_chunk_target=128, row_tile_target=8))
    ref_r = jax.block_until_ready(_dice_loss_ref(x_r, y_r, smooth=1.0))
    assert jnp.allclose(loss_r, ref_r, atol=1e-5, rtol=1e-5), (loss_r, ref_r)

    print("KERNEL_OK")
</pallas_src>

<mosaic_0001>
module attributes {stable_mosaic.version = 11 : i64} {
  func.func @_dice_sums_kernel(%arg0: i32, %arg1: i32, %arg2: memref<8x256xf32, #tpu.memory_space<vmem>>, %arg3: memref<8x256xbf16, #tpu.memory_space<vmem>>, %arg4: memref<8x1xf32, #tpu.memory_space<vmem>>, %arg5: memref<8x1xf32, #tpu.memory_space<vmem>>, %arg6: memref<8x1xf32, #tpu.memory_space<vmem>>) attributes {dimension_semantics = [#tpu.dimension_semantics<parallel>, #tpu.dimension_semantics<arbitrary>], iteration_bounds = array<i64: 1, 1>, scalar_prefetch = 0 : i64, scratch_operands = 0 : i64, tpu.core_type = #tpu.core_type<tc>, window_params = [{transform_indices = @transform_0, window_bounds = array<i64: 8, 256>}, {transform_indices = @transform_1, window_bounds = array<i64: 8, 256>}, {transform_indices = @transform_2, window_bounds = array<i64: 8, 1>}, {transform_indices = @transform_3, window_bounds = array<i64: 8, 1>}, {transform_indices = @transform_4, window_bounds = array<i64: 8, 1>}]} {
    %c0_i32 = arith.constant 0 : i32
    %0 = arith.cmpi eq, %arg1, %c0_i32 : i32
    %1 = arith.extui %0 : i1 to i32
    %c0_i32_0 = arith.constant 0 : i32
    %2 = arith.cmpi ne, %1, %c0_i32_0 : i32
    scf.if %2 {
      %cst_19 = arith.constant 0.000000e+00 : f32
      %27 = vector.broadcast %cst_19 : f32 to vector<8x1xf32>
      %c0_20 = arith.constant 0 : index
      %c0_21 = arith.constant 0 : index
      %28 = vector.load %arg4[%c0_20, %c0_21] : memref<8x1xf32, #tpu.memory_space<vmem>>, vector<8x1xf32>
      tpu.vector_store %arg4[%c0_20, %c0_21], %27 {strides = array<i32>} : memref<8x1xf32, #tpu.memory_space<vmem>>, vector<8x1xf32>,
      %cst_22 = arith.constant 0.000000e+00 : f32
      %29 = vector.broadcast %cst_22 : f32 to vector<8x1xf32>
      %c0_23 = arith.constant 0 : index
      %c0_24 = arith.constant 0 : index
      %30 = vector.load %arg5[%c0_23, %c0_24] : memref<8x1xf32, #tpu.memory_space<vmem>>, vector<8x1xf32>
      tpu.vector_store %arg5[%c0_23, %c0_24], %29 {strides = array<i32>} : memref<8x1xf32, #tpu.memory_space<vmem>>, vector<8x1xf32>,
      %cst_25 = arith.constant 0.000000e+00 : f32
      %31 = vector.broadcast %cst_25 : f32 to vector<8x1xf32>
      %c0_26 = arith.constant 0 : index
      %c0_27 = arith.constant 0 : index
      %32 = vector.load %arg6[%c0_26, %c0_27] : memref<8x1xf32, #tpu.memory_space<vmem>>, vector<8x1xf32>
      tpu.vector_store %arg6[%c0_26, %c0_27], %31 {strides = array<i32>} : memref<8x1xf32, #tpu.memory_space<vmem>>, vector<8x1xf32>,
    } else {
    }
    %c0 = arith.constant 0 : index
    %c0_1 = arith.constant 0 : index
    %3 = vector.load %arg2[%c0, %c0_1] : memref<8x256xf32, #tpu.memory_space<vmem>>, vector<8x256xf32>
    %4 = arith.negf %3 : vector<8x256xf32>
    %5 = math.exp %4 : vector<8x256xf32>
    %cst = arith.constant 1.000000e+00 : f32
    %6 = vector.broadcast %cst : f32 to vector<8x256xf32>
    %7 = arith.addf %6, %5 : vector<8x256xf32>
    %8 = arith.divf %6, %7 : vector<8x256xf32>
    %c0_2 = arith.constant 0 : index
    %c0_3 = arith.constant 0 : index
    %9 = vector.load %arg3[%c0_2, %c0_3] : memref<8x256xbf16, #tpu.memory_space<vmem>>, vector<8x256xbf16>
    %10 = arith.extf %9 : vector<8x256xbf16> to vector<8x256xf32>
    %c0_4 = arith.constant 0 : index
    %c0_5 = arith.constant 0 : index
    %11 = vector.load %arg4[%c0_4, %c0_5] : memref<8x1xf32, #tpu.memory_space<vmem>>, vector<8x1xf32>
    %12 = arith.mulf %8, %10 : vector<8x256xf32>
    %cst_6 = arith.constant dense<0.000000e+00> : vector<8xf32>
    %13 = vector.multi_reduction <add>, %12, %cst_6 [1] : vector<8x256xf32> to vector<8xf32>
    %14 = vector.shape_cast %13 : vector<8xf32> to vector<8x1xf32>
    %15 = arith.addf %11, %14 : vector<8x1xf32>
    %c0_7 = arith.constant 0 : index
    %c0_8 = arith.constant 0 : index
    %16 = vector.load %arg4[%c0_7, %c0_8] : memref<8x1xf32, #tpu.memory_space<vmem>>, vector<8x1xf32>
    tpu.vector_store %arg4[%c0_7, %c0_8], %15 {strides = array<i32>} : memref<8x1xf32, #tpu.memory_space<vmem>>, vector<8x1xf32>,
    %c0_9 = arith.constant 0 : index
    %c0_10 = arith.constant 0 : index
    %17 = vector.load %arg5[%c0_9, %c0_10] : memref<8x1xf32, #tpu.memory_space<vmem>>, vector<8x1xf32>
    %cst_11 = arith.constant dense<0.000000e+00> : vector<8xf32>
    %18 = vector.multi_reduction <add>, %8, %cst_11 [1] : vector<8x256xf32> to vector<8xf32>
    %19 = vector.shape_cast %18 : vector<8xf32> to vector<8x1xf32>
    %20 = arith.addf %17, %19 : vector<8x1xf32>
    %c0_12 = arith.constant 0 : index
    %c0_13 = arith.constant 0 : index
    %21 = vector.load %arg5[%c0_12, %c0_13] : memref<8x1xf32, #tpu.memory_space<vmem>>, vector<8x1xf32>
    tpu.vector_store %arg5[%c0_12, %c0_13], %20 {strides = array<i32>} : memref<8x1xf32, #tpu.memory_space<vmem>>, vector<8x1xf32>,
    %c0_14 = arith.constant 0 : index
    %c0_15 = arith.constant 0 : index
    %22 = vector.load %arg6[%c0_14, %c0_15] : memref<8x1xf32, #tpu.memory_space<vmem>>, vector<8x1xf32>
    %cst_16 = arith.constant dense<0.000000e+00> : vector<8xf32>
    %23 = vector.multi_reduction <add>, %10, %cst_16 [1] : vector<8x256xf32> to vector<8xf32>
    %24 = vector.shape_cast %23 : vector<8xf32> to vector<8x1xf32>
    %25 = arith.addf %22, %24 : vector<8x1xf32>
    %c0_17 = arith.constant 0 : index
    %c0_18 = arith.constant 0 : index
    %26 = vector.load %arg6[%c0_17, %c0_18] : memref<8x1xf32, #tpu.memory_space<vmem>>, vector<8x1xf32>
    tpu.vector_store %arg6[%c0_17, %c0_18], %25 {strides = array<i32>} : memref<8x1xf32, #tpu.memory_space<vmem>>, vector<8x1xf32>,
    return
  }
  func.func @transform_0(%arg0: i32, %arg1: i32) -> (i32, i32) {
    %c0_i32 = arith.constant 0 : i32
    return %arg0, %arg1 : i32, i32
  }
  func.func @transform_1(%arg0: i32, %arg1: i32) -> (i32, i32) {
    %c0_i32 = arith.constant 0 : i32
    return %arg0, %arg1 : i32, i32
  }
  func.func @transform_2(%arg0: i32, %arg1: i32) -> (i32, i32) {
    %c0_i32 = arith.constant 0 : i32
    %c0_i32_0 = arith.constant 0 : i32
    return %arg0, %c0_i32 : i32, i32
  }
  func.func @transform_3(%arg0: i32, %arg1: i32) -> (i32, i32) {
    %c0_i32 = arith.constant 0 : i32
    %c0_i32_0 = arith.constant 0 : i32
    return %arg0, %c0_i32 : i32, i32
  }
  func.func @transform_4(%arg0: i32, %arg1: i32) -> (i32, i32) {
    %c0_i32 = arith.constant 0 : i32
    %c0_i32_0 = arith.constant 0 : i32
    return %arg0, %c0_i32 : i32, i32
  }
}

</mosaic_0001>

<bundles_post_ra>
// kernel: tpu_custom_call.1
= control target key start
LH: loop header
LB: loop body
LE: loop exit
PB: predicated region body
PF: predicated region fallthrough
CT: control target
= control target key end

     0   :  { %10 = vsyncpa [#allocation3], 0  ;;  %s222_s0 = inlined_call_operand.hbm [shape: f32[8,256], index: 0, kind: input, shape index: {}]   ;;  %s223_s1 = inlined_call_operand.hbm [shape: bf16[8,256], index: 1, kind: input, shape index: {}]   ;;  %s224_s2 = inlined_call_operand.vmem [shape: f32[8,1], index: 2, kind: output, shape index: {0}]   ;;  %s225_s3 = inlined_call_operand.vmem [shape: f32[8,1], index: 3, kind: output, shape index: {1}]   ;;  %s226_s4 = inlined_call_operand.vmem [shape: f32[8,1], index: 4, kind: output, shape index: {2}]  }
   0x1   :  { %11 = vsyncpa [#allocation5], 0  ;;  %s155_s15 = smov [#allocation2]   ;;  %s156_s17 = smov [#allocation4]  }
   0x2   :  { %s18_s16 = sshll.u32 %s155_s15, 4  ;;  %s28_s18 = sshll.u32 %s156_s17, 4  ;;  %s19_s16 = int_to_ptr.vmem [resolvable:$true] %s18_s16  ;;  %s29_s18 = int_to_ptr.vmem [resolvable:$true] %s28_s18 }
   0x3   :  { %s119_s19 = scalar_lea.vmem %s19_s16, 256  ;;  %p124_p1 = scmp.lt.s32.totalorder %s19_s16, %s19_s16 }
   0x4   :  { %p120_p0 = scmp.ne.s32.totalorder %s19_s16, %s119_s19  ;;  %p125_p2 = scmp.lt.s32.totalorder %s119_s19, %s119_s19 }
   0x6   :  { %p126_p3 = por %p125_p2, %p124_p1 }
   0x8   :  { %p127_p4 = pnand %p126_p3, %p120_p0 }
   0xa   :  { %130 = shalt.err (!%p127_p4)
}
   0xb   :  { %21 = dma.hbm_to_vmem [thread:$0]  %s222_s0, 256, %s19_s16, [#allocation3]  }
   0xc   :  { %s139_s22 = scalar_lea.vmem %s29_s18, 128  ;;  %p144_p6 = scmp.lt.s32.totalorder %s29_s18, %s29_s18 }
   0xd   :  { %p140_p5 = scmp.ne.s32.totalorder %s29_s18, %s139_s22  ;;  %p145_p7 = scmp.lt.s32.totalorder %s139_s22, %s139_s22 }
   0xf   :  { %p146_p8 = por %p145_p7, %p144_p6 }
  0x11   :  { %p147_p9 = pnand %p146_p8, %p140_p5 }
  0x13   :  { %150 = shalt.err (!%p147_p9)
}
  0x14   :  { %31 = dma.hbm_to_vmem [thread:$0]  %s223_s1, 128, %s29_s18, [#allocation5]  }
  0x15   :  { %151 = dma.done.wait [#allocation3], 256  }
  0x16   :  { %152 = vsyncadd [#allocation3], 4294967040 }
  0x17   :  { %153 = dma.done.wait [#allocation5], 128  }
  0x18   :  { %154 = vsyncadd [#allocation5], 4294967168  ;;  %vm42_vm0 = vcmask 7168   ;;  %v157_v0 = vmov 0.0   ;;  %v46_v1 = vld [vmem:[#allocation2] sm:$0xff]  ;;  %v47_v2 = vld [vmem:[#allocation2 + $0x8] sm:$0xff] }
  0x19   :  { %43 = vst.msk [vmem:[%s224_s2] sm:$0xff] %vm42_vm0, %v157_v0  ;;  %44 = vst.msk [vmem:[%s225_s3] sm:$0xff] %vm42_vm0, %v157_v0  ;;  %v60_v3 = vld [vmem:[#allocation4] sm:$0xff]  ;;  %v98_v4 = vmul.f32 -1.442695, %v46_v1 }
  0x1a   :  { %45 = vst.msk [vmem:[%s226_s4] sm:$0xff] %vm42_vm0, %v157_v0  ;;  %v99_v5 = vmul.f32 -1.442695, %v47_v2  ;;  %v61_v6 = vunpack.c.l.bf16 %v60_v3  ;;  %v62_v7 = vunpack.c.h.bf16 %v60_v3 }
  0x1b   :  { %103 = vpow2.f32 %v98_v4 }
  0x1c   :  { %v79_v8 = vadd.f32 %v62_v7, %v61_v6  ;;  %105 = vpow2.f32 %v99_v5 }
  0x1e   :  { %80 = vadd.xlane.f32.xlu1 %v79_v8 }
  0x20   :  { %v63_v22 = vld [vmem:[%s224_s2] sm:$0xff] }
  0x21   :  { %v78_v19 = vld [vmem:[%s226_s4] sm:$0xff] }
  0x22   :  { %v72_v25 = vld [vmem:[%s225_s3] sm:$0xff] }
  0x28   :  { %v104_v9 = vpop.eup %103 }
  0x29   :  { %v106_v10 = vpop.eup %105  ;;  %v54_v11 = vadd.f32 1.0, %v104_v9 }
  0x2a   :  { %v55_v12 = vadd.f32 1.0, %v106_v10 }
  0x2b   :  { %107 = vrcp.f32 %v54_v11 }
  0x2c   :  { %109 = vrcp.f32 %v55_v12 }
  0x38   :  { %v108_v13 = vpop.eup %107 }
  0x39   :  { %v110_v14 = vpop.eup %109  ;;  %v64_v15 = vmul.f32 %v108_v13, %v61_v6 }
  0x3a   :  { %v65_v16 = vmul.f32 %v110_v14, %v62_v7  ;;  %v73_v18 = vadd.f32 %v110_v14, %v108_v13 }
  0x3c   :  { %v66_v17 = vadd.f32 %v65_v16, %v64_v15 }
  0x3e   :  { %67 = vadd.xlane.f32.xlu0 %v66_v17 }
  0x42   :  { %74 = vadd.xlane.f32.xlu0 %v73_v18 }
  0xa7   :  { %v81_v20 = vpop.xlane.xlu1 %80 }
  0xa8   :  { %v82_v21 = vadd.f32 %v81_v20, %v78_v19 }
  0xaa   :  { %83 = vst.msk [vmem:[%s226_s4] sm:$0xff] %vm42_vm0, %v82_v21 }
  0xc7   :  { %v68_v23 = vpop.xlane.xlu0 %67 }
  0xc8   :  { %v69_v24 = vadd.f32 %v68_v23, %v63_v22 }
  0xca   :  { %71 = vst.msk [vmem:[%s224_s2] sm:$0xff] %vm42_vm0, %v69_v24 }
  0xcb   :  { %v75_v26 = vpop.xlane.xlu0 %74 }
  0xcc   :  { %v76_v27 = vadd.f32 %v75_v26, %v72_v25 }
  0xce   :  { %77 = vst.msk [vmem:[%s225_s3] sm:$0xff] %vm42_vm0, %v76_v27 }
  0xcf   :  { %96 = vsyncpa [#allocation3], 1 }
  0xd0   :  { %97 = vsyncpa [#allocation5], 1 }

</bundles_post_ra>
